<compile_context>
chip_gen: v5e
topology: v5e:2x2
jax: 0.10.0
libtpu: 0.0.40
codegen_flags: <defaults>
</compile_context>

<pallas_src>
import functools

import jax
import jax.numpy as jnp
from jax.experimental import pallas as pl
from jax.experimental.pallas import tpu as pltpu


def vae_forward_kernel(x_ref, eps_ref,
                       w_in_ref, b_in_ref,
                       w_muvar_ref, b_muvar_ref,
                       w_hid_ref, b_hid_ref,
                       w_out_ref, b_out_ref,
                       out_ref):
    """One batch-lane tile (features x batch layout): encode -> reparam -> decode.

    x_ref:   (D, TN)         eps_ref: (Z, TN)
    weights: torch [out, in] layout, biases as (out, 1) columns
    out_ref: (D + 2Z, TN)  == [ sigmoid(logits) ; z_mu ; z_var ] stacked on sublanes
    """
    d_dim = x_ref.shape[0]
    z_dim = eps_ref.shape[0]

    def mm(w_ref, a):
        # f32 operands, f32 accumulation (MXU is nearly idle at these sizes).
        return jnp.dot(w_ref[...], a, preferred_element_type=jnp.float32)

    x_t = x_ref[...]                                            # (D, TN)

    # ---- encode: hid_in = relu(W_in @ x^T + b_in) ----
    hid_in = jnp.maximum(mm(w_in_ref, x_t) + b_in_ref[...], 0.0)   # (H, TN)

    # ---- fused mu|logvar head: (2Z, TN); mu/var split is sublane-aligned ----
    muvar = mm(w_muvar_ref, hid_in) + b_muvar_ref[...]
    z_mu = muvar[:z_dim, :]
    z_var = muvar[z_dim:, :]

    # ---- reparameterize: x_sample = eps * exp(z_var / 2) + z_mu ----
    std = jnp.exp(z_var * 0.5)
    x_sample = eps_ref[...] * std + z_mu                          # (Z, TN)

    # ---- decode: sigmoid(W_out @ relu(W_hid @ x_sample + b_hid) + b_out) ----
    hid_out = jnp.maximum(mm(w_hid_ref, x_sample) + b_hid_ref[...], 0.0)
    logits = mm(w_out_ref, hid_out) + b_out_ref[...]              # (D, TN)

    # Single lane-dense output slab; both writes are sublane-aligned (D, 2Z % 8 == 0).
    out_ref[:d_dim, :] = jax.nn.sigmoid(logits)
    out_ref[d_dim:, :] = muvar


def init_vae_params(key, input_dim, hidden_dim, z_dim):
    """Deterministic init mimicking torch.nn.Linear U(-1/sqrt(fan_in), 1/sqrt(fan_in)).

    Weights are kept in the native torch [out_features, in_features] layout.
    """
    def linear(k, fan_in, fan_out):
        kw, kb = jax.random.split(k)
        bound = 1.0 / jnp.sqrt(float(fan_in))
        w = jax.random.uniform(kw, (fan_out, fan_in), jnp.float32, -bound, bound)
        b = jax.random.uniform(kb, (fan_out,), jnp.float32, -bound, bound)
        return w, b

    k1, k2, k3, k4, k5 = jax.random.split(key, 5)
    w_in, b_in = linear(k1, input_dim, hidden_dim)
    w_mu, b_mu = linear(k2, hidden_dim, z_dim)
    w_var, b_var = linear(k3, hidden_dim, z_dim)
    w_hid, b_hid = linear(k4, z_dim, hidden_dim)
    w_out, b_out = linear(k5, hidden_dim, input_dim)
    return dict(w_in=w_in, b_in=b_in, w_mu=w_mu, b_mu=b_mu,
                w_var=w_var, b_var=b_var, w_hid=w_hid, b_hid=b_hid,
                w_out=w_out, b_out=b_out)


def pack_vae_params(p):
    """One-time packing (hoisted out of the per-call path): fuse the mu|logvar
    head and reshape biases to (out, 1) columns for the features-x-batch layout."""
    return dict(
        w_in=p["w_in"], b_in=p["b_in"][:, None],
        w_muvar=jnp.concatenate([p["w_mu"], p["w_var"]], axis=0),
        b_muvar=jnp.concatenate([p["b_mu"], p["b_var"]], axis=0)[:, None],
        w_hid=p["w_hid"], b_hid=p["b_hid"][:, None],
        w_out=p["w_out"], b_out=p["b_out"][:, None],
    )


def _auto_batch_tile(batch):
    """Lane-axis tile: cover small batches in <=2 tiles (v7x has 2 TCs), cap at 2048."""
    if batch <= 128:
        return batch                       # full-extent block is always legal
    half = -(-batch // 2)                  # ceil(batch / 2)
    half_rounded = ((half + 127) // 128) * 128
    return max(128, min(2048, half_rounded))


@functools.partial(jax.jit, static_argnames=("tn",))
def vae_forward(x, eps, packed, *, tn=None):
    """Returns (predicted, z_mu, z_var), matching the PyTorch forward.

    x: (B, D) inputs, eps: (B, Z) reparameterization noise (torch.randn_like),
    packed: output of pack_vae_params().
    """
    B, D = x.shape
    Z = eps.shape[1]
    H = packed["w_in"].shape[0]
    if tn is None:
        tn = _auto_batch_tile(B)
    num_tiles = pl.cdiv(B, tn)

    # Layout plumbing: put the batch on the 128-lane axis (features x batch).
    x_t = x.T                              # (D, B)
    eps_t = eps.T                          # (Z, B)

    def tile_spec(rows):
        return pl.BlockSpec((rows, tn), lambda i: (0, i))

    def const_spec(shape):
        return pl.BlockSpec(shape, lambda i: (0, 0))

    # NOTE: if B % tn != 0 the last tile's padded lanes carry garbage through
    # exp()/sigmoid(); those lanes are never written back, so it is harmless.
    out_t = pl.pallas_call(
        vae_forward_kernel,
        out_shape=jax.ShapeDtypeStruct((D + 2 * Z, B), jnp.float32),
        grid=(num_tiles,),
        in_specs=[
            tile_spec(D),                  # x^T
            tile_spec(Z),                  # eps^T
            const_spec((H, D)),            # w_in     (resident)
            const_spec((H, 1)),            # b_in
            const_spec((2 * Z, H)),        # w_muvar
            const_spec((2 * Z, 1)),        # b_muvar
            const_spec((H, Z)),            # w_hid
            const_spec((H, 1)),            # b_hid
            const_spec((D, H)),            # w_out
            const_spec((D, 1)),            # b_out
        ],
        out_specs=tile_spec(D + 2 * Z),
        compiler_params=pltpu.CompilerParams(
            dimension_semantics=("parallel",),
        ),
    )(x_t, eps_t,
      packed["w_in"], packed["b_in"],
      packed["w_muvar"], packed["b_muvar"],
      packed["w_hid"], packed["b_hid"],
      packed["w_out"], packed["b_out"])

    pred = out_t[:D, :].T
    z_mu = out_t[D:D + Z, :].T
    z_var = out_t[D + Z:, :].T
    return pred, z_mu, z_var


def vae_forward_ref(x, eps, p):
    """Pure-JAX reference (f32), same math as the kernel on the original layout."""
    hid_in = jnp.maximum(x @ p["w_in"].T + p["b_in"], 0.0)
    z_mu = hid_in @ p["w_mu"].T + p["b_mu"]
    z_var = hid_in @ p["w_var"].T + p["b_var"]
    std = jnp.exp(z_var * 0.5)
    x_sample = eps * std + z_mu
    hid_out = jnp.maximum(x_sample @ p["w_hid"].T + p["b_hid"], 0.0)
    predicted = jax.nn.sigmoid(hid_out @ p["w_out"].T + p["b_out"])
    return predicted, z_mu, z_var


if __name__ == "__main__":
    # Shapes consistent with the module (encode_numpy implies 4*4 = 16 inputs).
    batch, input_dim, hidden_dim, z_dim = 256, 16, 32, 8

    key = jax.random.PRNGKey(0)
    k_params, k_x, k_eps = jax.random.split(key, 3)

    params = init_vae_params(k_params, input_dim, hidden_dim, z_dim)
    packed = pack_vae_params(params)       # hoisted out of the per-call path
    x = jax.random.uniform(k_x, (batch, input_dim), jnp.float32)
    # torch.randn_like() reparameterization noise, drawn in the wrapper.
    eps = jax.random.normal(k_eps, (batch, z_dim), jnp.float32)

    pred, z_mu, z_var = jax.block_until_ready(vae_forward(x, eps, packed))

    # Correctness check against the pure-JAX f32 reference.
    pred_r, mu_r, var_r = vae_forward_ref(x, eps, params)
    assert pred.shape == (batch, input_dim)
    assert z_mu.shape == (batch, z_dim) and z_var.shape == (batch, z_dim)
    # Tolerance covers possible MXU default-precision (bf16-pass) differences
    # between the Mosaic matmul and the XLA reference matmul.
    assert jnp.allclose(pred, pred_r, atol=1e-2, rtol=1e-2), "predicted mismatch"
    assert jnp.allclose(z_mu, mu_r, atol=1e-2, rtol=1e-2), "z_mu mismatch"
    assert jnp.allclose(z_var, var_r, atol=1e-2, rtol=1e-2), "z_var mismatch"

    print("KERNEL_OK")
</pallas_src>

<mosaic_0001>
module attributes {stable_mosaic.version = 11 : i64} {
  func.func @vae_forward_kernel(%arg0: i32, %arg1: memref<16x128xf32, #tpu.memory_space<vmem>>, %arg2: memref<8x128xf32, #tpu.memory_space<vmem>>, %arg3: memref<32x16xf32, #tpu.memory_space<vmem>>, %arg4: memref<32x1xf32, #tpu.memory_space<vmem>>, %arg5: memref<16x32xf32, #tpu.memory_space<vmem>>, %arg6: memref<16x1xf32, #tpu.memory_space<vmem>>, %arg7: memref<32x8xf32, #tpu.memory_space<vmem>>, %arg8: memref<32x1xf32, #tpu.memory_space<vmem>>, %arg9: memref<16x32xf32, #tpu.memory_space<vmem>>, %arg10: memref<16x1xf32, #tpu.memory_space<vmem>>, %arg11: memref<32x128xf32, #tpu.memory_space<vmem>>) attributes {dimension_semantics = [#tpu.dimension_semantics<parallel>], iteration_bounds = array<i64: 2>, scalar_prefetch = 0 : i64, scratch_operands = 0 : i64, tpu.core_type = #tpu.core_type<tc>, window_params = [{transform_indices = @transform_0, window_bounds = array<i64: 16, 128>}, {transform_indices = @transform_1, window_bounds = array<i64: 8, 128>}, {pipeline_mode = #tpu.pipeline_mode<synchronous>, transform_indices = @transform_2, window_bounds = array<i64: 32, 16>}, {pipeline_mode = #tpu.pipeline_mode<synchronous>, transform_indices = @transform_3, window_bounds = array<i64: 32, 1>}, {pipeline_mode = #tpu.pipeline_mode<synchronous>, transform_indices = @transform_4, window_bounds = array<i64: 16, 32>}, {pipeline_mode = #tpu.pipeline_mode<synchronous>, transform_indices = @transform_5, window_bounds = array<i64: 16, 1>}, {pipeline_mode = #tpu.pipeline_mode<synchronous>, transform_indices = @transform_6, window_bounds = array<i64: 32, 8>}, {pipeline_mode = #tpu.pipeline_mode<synchronous>, transform_indices = @transform_7, window_bounds = array<i64: 32, 1>}, {pipeline_mode = #tpu.pipeline_mode<synchronous>, transform_indices = @transform_8, window_bounds = array<i64: 16, 32>}, {pipeline_mode = #tpu.pipeline_mode<synchronous>, transform_indices = @transform_9, window_bounds = array<i64: 16, 1>}, {transform_indices = @transform_10, window_bounds = array<i64: 32, 128>}]} {
    %c0 = arith.constant 0 : index
    %c0_0 = arith.constant 0 : index
    %0 = vector.load %arg1[%c0, %c0_0] : memref<16x128xf32, #tpu.memory_space<vmem>>, vector<16x128xf32>
    %c0_1 = arith.constant 0 : index
    %c0_2 = arith.constant 0 : index
    %1 = vector.load %arg3[%c0_1, %c0_2] : memref<32x16xf32, #tpu.memory_space<vmem>>, vector<32x16xf32>
    %cst = arith.constant dense<0.000000e+00> : vector<32x128xf32>
    %2 = tpu.matmul %1, %0, %cst {dimension_numbers = #tpu.dot_dimension_numbers<[1], [0], [0], [1], [0, 0, 1, 1], [], []>} : vector<32x16xf32>, vector<16x128xf32>, vector<32x128xf32> -> vector<32x128xf32>
    %c0_3 = arith.constant 0 : index
    %c0_4 = arith.constant 0 : index
    %3 = vector.load %arg4[%c0_3, %c0_4] : memref<32x1xf32, #tpu.memory_space<vmem>>, vector<32x1xf32>
    %4 = vector.broadcast %3 : vector<32x1xf32> to vector<32x128xf32>
    %5 = arith.addf %2, %4 : vector<32x128xf32>
    %cst_5 = arith.constant 0.000000e+00 : f32
    %6 = vector.broadcast %cst_5 : f32 to vector<32x128xf32>
    %7 = arith.maximumf %5, %6 : vector<32x128xf32>
    %c0_6 = arith.constant 0 : index
    %c0_7 = arith.constant 0 : index
    %8 = vector.load %arg5[%c0_6, %c0_7] : memref<16x32xf32, #tpu.memory_space<vmem>>, vector<16x32xf32>
    %cst_8 = arith.constant dense<0.000000e+00> : vector<16x128xf32>
    %9 = tpu.matmul %8, %7, %cst_8 {dimension_numbers = #tpu.dot_dimension_numbers<[1], [0], [0], [1], [0, 0, 1, 1], [], []>} : vector<16x32xf32>, vector<32x128xf32>, vector<16x128xf32> -> vector<16x128xf32>
    %c0_9 = arith.constant 0 : index
    %c0_10 = arith.constant 0 : index
    %10 = vector.load %arg6[%c0_9, %c0_10] : memref<16x1xf32, #tpu.memory_space<vmem>>, vector<16x1xf32>
    %11 = vector.broadcast %10 : vector<16x1xf32> to vector<16x128xf32>
    %12 = arith.addf %9, %11 : vector<16x128xf32>
    %13 = vector.extract_strided_slice %12 {offsets = [0, 0], sizes = [8, 128], strides = [1, 1]} : vector<16x128xf32> to vector<8x128xf32>
    %14 = vector.extract_strided_slice %12 {offsets = [8, 0], sizes = [8, 128], strides = [1, 1]} : vector<16x128xf32> to vector<8x128xf32>
    %cst_11 = arith.constant 5.000000e-01 : f32
    %15 = vector.broadcast %cst_11 : f32 to vector<8x128xf32>
    %16 = arith.mulf %14, %15 : vector<8x128xf32>
    %17 = math.exp %16 : vector<8x128xf32>
    %c0_12 = arith.constant 0 : index
    %c0_13 = arith.constant 0 : index
    %18 = vector.load %arg2[%c0_12, %c0_13] : memref<8x128xf32, #tpu.memory_space<vmem>>, vector<8x128xf32>
    %19 = arith.mulf %18, %17 : vector<8x128xf32>
    %20 = arith.addf %19, %13 : vector<8x128xf32>
    %c0_14 = arith.constant 0 : index
    %c0_15 = arith.constant 0 : index
    %21 = vector.load %arg7[%c0_14, %c0_15] : memref<32x8xf32, #tpu.memory_space<vmem>>, vector<32x8xf32>
    %cst_16 = arith.constant dense<0.000000e+00> : vector<32x128xf32>
    %22 = tpu.matmul %21, %20, %cst_16 {dimension_numbers = #tpu.dot_dimension_numbers<[1], [0], [0], [1], [0, 0, 1, 1], [], []>} : vector<32x8xf32>, vector<8x128xf32>, vector<32x128xf32> -> vector<32x128xf32>
    %c0_17 = arith.constant 0 : index
    %c0_18 = arith.constant 0 : index
    %23 = vector.load %arg8[%c0_17, %c0_18] : memref<32x1xf32, #tpu.memory_space<vmem>>, vector<32x1xf32>
    %24 = vector.broadcast %23 : vector<32x1xf32> to vector<32x128xf32>
    %25 = arith.addf %22, %24 : vector<32x128xf32>
    %cst_19 = arith.constant 0.000000e+00 : f32
    %26 = vector.broadcast %cst_19 : f32 to vector<32x128xf32>
    %27 = arith.maximumf %25, %26 : vector<32x128xf32>
    %c0_20 = arith.constant 0 : index
    %c0_21 = arith.constant 0 : index
    %28 = vector.load %arg9[%c0_20, %c0_21] : memref<16x32xf32, #tpu.memory_space<vmem>>, vector<16x32xf32>
    %cst_22 = arith.constant dense<0.000000e+00> : vector<16x128xf32>
    %29 = tpu.matmul %28, %27, %cst_22 {dimension_numbers = #tpu.dot_dimension_numbers<[1], [0], [0], [1], [0, 0, 1, 1], [], []>} : vector<16x32xf32>, vector<32x128xf32>, vector<16x128xf32> -> vector<16x128xf32>
    %c0_23 = arith.constant 0 : index
    %c0_24 = arith.constant 0 : index
    %30 = vector.load %arg10[%c0_23, %c0_24] : memref<16x1xf32, #tpu.memory_space<vmem>>, vector<16x1xf32>
    %31 = vector.broadcast %30 : vector<16x1xf32> to vector<16x128xf32>
    %32 = arith.addf %29, %31 : vector<16x128xf32>
    %33 = arith.negf %32 : vector<16x128xf32>
    %34 = math.exp %33 : vector<16x128xf32>
    %cst_25 = arith.constant 1.000000e+00 : f32
    %35 = vector.broadcast %cst_25 : f32 to vector<16x128xf32>
    %36 = arith.addf %35, %34 : vector<16x128xf32>
    %37 = arith.divf %35, %36 : vector<16x128xf32>
    %c0_26 = arith.constant 0 : index
    %c0_27 = arith.constant 0 : index
    %38 = vector.load %arg11[%c0_26, %c0_27] : memref<32x128xf32, #tpu.memory_space<vmem>>, vector<16x128xf32>
    tpu.vector_store %arg11[%c0_26, %c0_27], %37 {strides = array<i32>} : memref<32x128xf32, #tpu.memory_space<vmem>>, vector<16x128xf32>,
    %c16 = arith.constant 16 : index
    %c0_28 = arith.constant 0 : index
    %39 = vector.load %arg11[%c16, %c0_28] : memref<32x128xf32, #tpu.memory_space<vmem>>, vector<16x128xf32>
    tpu.vector_store %arg11[%c16, %c0_28], %12 {strides = array<i32>} : memref<32x128xf32, #tpu.memory_space<vmem>>, vector<16x128xf32>,
    return
  }
  func.func @transform_0(%arg0: i32) -> (i32, i32) {
    %c0_i32 = arith.constant 0 : i32
    %c0_i32_0 = arith.constant 0 : i32
    return %c0_i32, %arg0 : i32, i32
  }
  func.func @transform_1(%arg0: i32) -> (i32, i32) {
    %c0_i32 = arith.constant 0 : i32
    %c0_i32_0 = arith.constant 0 : i32
    return %c0_i32, %arg0 : i32, i32
  }
  func.func @transform_2(%arg0: i32) -> (i32, i32) {
    %c0_i32 = arith.constant 0 : i32
    %c0_i32_0 = arith.constant 0 : i32
    %c0_i32_1 = arith.constant 0 : i32
    return %c0_i32, %c0_i32_0 : i32, i32
  }
  func.func @transform_3(%arg0: i32) -> (i32, i32) {
    %c0_i32 = arith.constant 0 : i32
    %c0_i32_0 = arith.constant 0 : i32
    %c0_i32_1 = arith.constant 0 : i32
    return %c0_i32, %c0_i32_0 : i32, i32
  }
  func.func @transform_4(%arg0: i32) -> (i32, i32) {
    %c0_i32 = arith.constant 0 : i32
    %c0_i32_0 = arith.constant 0 : i32
    %c0_i32_1 = arith.constant 0 : i32
    return %c0_i32, %c0_i32_0 : i32, i32
  }
  func.func @transform_5(%arg0: i32) -> (i32, i32) {
    %c0_i32 = arith.constant 0 : i32
    %c0_i32_0 = arith.constant 0 : i32
    %c0_i32_1 = arith.constant 0 : i32
    return %c0_i32, %c0_i32_0 : i32, i32
  }
  func.func @transform_6(%arg0: i32) -> (i32, i32) {
    %c0_i32 = arith.constant 0 : i32
    %c0_i32_0 = arith.constant 0 : i32
    %c0_i32_1 = arith.constant 0 : i32
    return %c0_i32, %c0_i32_0 : i32, i32
  }
  func.func @transform_7(%arg0: i32) -> (i32, i32) {
    %c0_i32 = arith.constant 0 : i32
    %c0_i32_0 = arith.constant 0 : i32
    %c0_i32_1 = arith.constant 0 : i32
    return %c0_i32, %c0_i32_0 : i32, i32
  }
  func.func @transform_8(%arg0: i32) -> (i32, i32) {
    %c0_i32 = arith.constant 0 : i32
    %c0_i32_0 = arith.constant 0 : i32
    %c0_i32_1 = arith.constant 0 : i32
    return %c0_i32, %c0_i32_0 : i32, i32
  }
  func.func @transform_9(%arg0: i32) -> (i32, i32) {
    %c0_i32 = arith.constant 0 : i32
    %c0_i32_0 = arith.constant 0 : i32
    %c0_i32_1 = arith.constant 0 : i32
    return %c0_i32, %c0_i32_0 : i32, i32
  }
  func.func @transform_10(%arg0: i32) -> (i32, i32) {
    %c0_i32 = arith.constant 0 : i32
    %c0_i32_0 = arith.constant 0 : i32
    return %c0_i32, %arg0 : i32, i32
  }
}

</mosaic_0001>

<bundles_post_ra>
// kernel: vae_forward.1
= control target key start
LH: loop header
LB: loop body
LE: loop exit
PB: predicated region body
PF: predicated region fallthrough
CT: control target
= control target key end

     0   :  { %s965_s13 = smov 0   ;;  %s967_s14 = smov 0   ;;  %s1114_s0 = inlined_call_operand.vmem [shape: f32[16,256], index: 0, kind: input, shape index: {}]   ;;  %s1115_s1 = inlined_call_operand.vmem [shape: f32[8,256], index: 1, kind: input, shape index: {}]   ;;  %s1116_s2 = inlined_call_operand.vmem [shape: f32[32,16], index: 2, kind: input, shape index: {}]   ;;  %s1117_s3 = inlined_call_operand.vmem [shape: f32[32,1], index: 3, kind: input, shape index: {}]   ;;  %s1118_s4 = inlined_call_operand.vmem [shape: f32[16,32], index: 4, kind: input, shape index: {}]   ;;  %s1119_s5 = inlined_call_operand.vmem [shape: f32[16,1], index: 5, kind: input, shape index: {}]   ;;  %s1120_s6 = inlined_call_operand.vmem [shape: f32[32,8], index: 6, kind: input, shape index: {}]   ;;  %s1121_s7 = inlined_call_operand.vmem [shape: f32[32,1], index: 7, kind: input, shape index: {}]   ;;  %s1122_s8 = inlined_call_operand.vmem [shape: f32[16,32], index: 8, kind: input, shape index: {}]   ;;  %s1123_s9 = inlined_call_operand.vmem [shape: f32[16,1], index: 9, kind: input, shape index: {}]   ;;  %s1124_s10 = inlined_call_operand.vmem [shape: f32[32,256], index: 10, kind: output, shape index: {}]  }
   0x1   :  { %s969_s15 = smov 0  }
   0x2 LB: > { %s978_s16 = sadd.s32 4294967295, %s907_s15   ;;  %s980_s17 = sadd.s32 1, %s907_s15   ;;  %s907_s15 = sphi %s969_s15, %s1128_s15   ;;  %s903_s14 = sphi %s967_s14, %s1127_s14   ;;  %s899_s13 = sphi %s965_s13, %s1126_s13  }
   0x3   : > { %s24_s18 = ssub.s32 %s907_s15, %s980_s17  ;;  %s27_s19 = sadd.s32 1, %s903_s14 }
   0x4   : > { %p25_p0 = scmp.eq.s32.totalorder %s24_s18, 0  ;;  %p34_p1 = scmp.ne.s32.totalorder %s903_s14, %s899_s13 }
   0x5   : > { %p35_p2 = scmp.eq.s32.totalorder %s907_s15, 0  ;;  %p258_p3 = scmp.eq.s32.totalorder %s978_s16, 1 }
   0x6   : > { %s988_s20 = scalar_select %p25_p0, %s903_s14, %s27_s19  }
   0x7   : > { %p36_p4 = por %p35_p2, %p34_p1  ;;  %p990_p5 = por %p258_p3, %p34_p1 }
   0x8   : > { %p820_p6 = scmp.ge.s32.totalorder %s907_s15, 2 }
   0xa   : > { %304 = sbr.rel (%p820_p6) target bundleno = 21 (0x15), region = 48 }
   0xf   : > { %307 = sbr.rel (!%p36_p4) target bundleno = 21 (0x15), region = 52  ;;  %s309_s22 = sand.u32 (%p36_p4), 1, %s903_s14  }
  0x10   : > { %s822_s23 = sshll.u32 (%p36_p4), %s907_s15, 3  ;;  %s821_s24 = sshll.u32 (%p36_p4), %s309_s22, 4 }
  0x11   : > { %s313_s27 = scalar_lea.vmem (%p36_p4), %s1114_s0, %s822_s23  ;;  %s311_s28 = scalar_lea.vmem (%p36_p4), [#allocation2], %s821_s24 }
  0x12   : > { %v344_v0 = vld [vmem:[%s313_s27] sm:$0xff] (%p36_p4)  ;;  %v346_v1 = vld [vmem:[%s313_s27 + $0x10] sm:$0xff] (%p36_p4) }
  0x13   : > { %345 = vst [vmem:[%s311_s28] sm:$0xff] (%p36_p4), %v344_v0 }
  0x14   : > { %347 = vst [vmem:[%s311_s28 + $0x8] sm:$0xff] %v346_v1 }
  0x15 PF: > { %p823_p7 = scmp.ge.s32.totalorder %s907_s15, 1  ;;  %p359_p8 = scmp.lt.s32.totalorder %s907_s15, 3 }
  0x17   : > { %p360_p9 = pnand %p823_p7, %p359_p8 }
  0x18   : > { %s366_s11 = sand.u32 (!%p360_p9), 1, %s899_s13   ;;  %p406_p10 = scmp.lt.s32.totalorder (!%p360_p9), %s978_s16, 1 }
  0x19   : > { %363 = sbr.rel (%p360_p9) target bundleno = 685 (0x2ad), region = 94  ;;  %s824_s19 = sshll.u32 (!%p360_p9), %s366_s11, 4 }
  0x1a   : > { %s368_s15 = scalar_lea.vmem (!%p360_p9), [#allocation2], %s824_s19  ;;  %s825_s28 = sshll.u32 (!%p360_p9), %s366_s11, 5 }
  0x1b   : > { %s1063_s29 = scalar_lea.vmem (!%p360_p9), [#allocation3], %s825_s28 }
  0x1e   : > { %v419_v2 = vld [vmem:[%s1117_s3 + $0x18] sm:$0xff]  ;;  %v417_v3 = vld [vmem:[%s1117_s3 + $0x8] sm:$0xff]  ;;  %v909_v4 = vmov 0   ;;  %v410_v6 = vld [vmem:[%s368_s15] sm:$0xff]  ;;  %vm440_vm0 = vcmask 130048   ;;  %vm500_vm1 = vcmask 261120  }
  0x1f   : > { %872 = vset.pattern.permute.xlu0 %v909_v4  ;;  %873 = vset.pattern.permute.xlu1 %v909_v4  ;;  %v411_v5 = vld [vmem:[%s368_s15 + $0x8] sm:$0xff]  ;;  %v412_v7 = vld [vmem:[%s1116_s2] sm:$0xff]  ;;  %v418_v9 = vld [vmem:[%s1117_s3 + $0x10] sm:$0xff]  ;;  %s407_s30 = scalar_select %p406_p10, %s978_s16, 1  ;;  %vm564_vm2 = vcmask 64512  }
  0x20   : > { %437 = vperm.xlu0 %872, %v419_v2   ;;  %427 = vperm.xlu1 %873, %v417_v3   ;;  %v415_v8 = vld [vmem:[%s1116_s2 + $0x18] sm:$0xff]  ;;  %v416_v10 = vld [vmem:[%s1117_s3] sm:$0xff]  ;;  %v413_v11 = vld [vmem:[%s1116_s2 + $0x8] sm:$0xff]  ;;  %s842_s13 = sshll.u32 (%p990_p5), %s978_s16, 3 }
  0x21   : > { %874 = vset.pattern.permute.xlu2 %v909_v4  ;;  %467 = vmatpush.msra.mxu0 %v411_v5  ;;  %v543_v12 = vld [vmem:[%s1121_s7 + $0x18] sm:$0xff]  ;;  %v542_v13 = vld [vmem:[%s1121_s7 + $0x10] sm:$0xff]  ;;  %v540_v15 = vld [vmem:[%s1121_s7] sm:$0xff]  ;;  %s826_s12 = sshll.u32 %s407_s30, 3  ;;  %s703_s15 = scalar_lea.vmem (%p990_p5), %s1124_s10, %s842_s13 }
  0x22   : > { %845 = vmatpush.msra.mxu1 %v411_v5  ;;  %v414_v14 = vld [vmem:[%s1116_s2 + $0x10] sm:$0xff]  ;;  %v612_v16 = vld [vmem:[%s1123_s9] sm:$0xff]  ;;  %v489_v21 = vld [vmem:[%s1119_s5 + $0x8] sm:$0xff]  ;;  %s409_s11 = scalar_lea.vmem %s1115_s1, %s826_s12 }
  0x23   : > { %468 = vmatpush.msra.mxu0 %v410_v6  ;;  %497 = vperm.xlu2 %874, %v489_v21   ;;  %v488_v25 = vld [vmem:[%s1119_s5] sm:$0xff]  ;;  %v541_v28 = vld [vmem:[%s1121_s7 + $0x8] sm:$0xff]  ;;  %v538_v53 = vld [vmem:[%s1120_s6 + $0x10] sm:$0xff] }
  0x24   : > { %846 = vmatpush.msra.mxu1 %v410_v6  ;;  %827 = vmatmul.msk.f32.vlgmr.msra.gmra.mxu0 %vm440_vm0, %v412_v7  ;;  %v486_v36 = vld [vmem:[%s1118_s4] sm:$0xff]  ;;  %v613_v37 = vld [vmem:[%s1123_s9 + $0x8] sm:$0xff]  ;;  %v539_v54 = vld [vmem:[%s1120_s6 + $0x18] sm:$0xff] }
  0x25   : > { %830 = vmatmul.msk.f32.vlgmr.msra.gmra.mxu1 %vm440_vm0, %v415_v8  ;;  %v487_v38 = vld [vmem:[%s1118_s4 + $0x8] sm:$0xff]  ;;  %v533_v47 = vld [vmem:[%s409_s11] sm:$0xff] }
  0x26   : > { %v536_v51 = vld [vmem:[%s1120_s6] sm:$0xff]  ;;  %v537_v52 = vld [vmem:[%s1120_s6 + $0x8] sm:$0xff] }
  0x27   : > { %v610_v7 = vld [vmem:[%s1122_s8] sm:$0xff]  ;;  %v611_v8 = vld [vmem:[%s1122_s8 + $0x8] sm:$0xff] }
  0x28   : > { %432 = vperm.xlu0 %872, %v418_v9   ;;  %422 = vperm.xlu1 %873, %v416_v10  }
  0x2b   : > { %492 = vperm.xlu2 %874, %v488_v25  }
  0x2c   : > { %828 = vmatmul.msk.f32.gmra.mxu0 %vm440_vm0, %v413_v11 }
  0x30   : > { %561 = vperm.xlu0 %872, %v543_v12   ;;  %556 = vperm.xlu1 %873, %v542_v13  }
  0x33   : > { %551 = vperm.xlu2 %874, %v541_v28  }
  0x34   : > { %829 = vmatmul.msk.f32.gmra.mxu0 %vm440_vm0, %v414_v14 }
  0x38   : > { %546 = vperm.xlu0 %872, %v540_v15   ;;  %616 = vperm.xlu1 %873, %v612_v16  }
  0x3b   : > { %621 = vperm.xlu2 %874, %v613_v37  }
  0x7d   : > { %v498_v39 = vpop.permute.xlu2 %497 }
  0x85   : > { %v493_v40 = vpop.permute.xlu2 %492 }
  0x8d   : > { %v552_v63 = vpop.permute.xlu2 %551 }
  0x92   : > { %v438_v18 = vpop.permute.xlu0 %437  ;;  %v428_v23 = vpop.permute.xlu1 %427 }
  0x95   : > { %v622_v13 = vpop.permute.xlu2 %621 }
  0x9a   : > { %v433_v26 = vpop.permute.xlu0 %432  ;;  %v423_v31 = vpop.permute.xlu1 %422 }
  0xa1   : > { %v470_v17 = vpop.f32.mrf.mxu0 }
  0xa2   : > { %v479_v19 = vpop.f32.mrf.mxu1  ;;  %v471_v32 = vadd.f32 %v470_v17, %v423_v31  ;;  %v562_v58 = vpop.permute.xlu0 %561 }
  0xa3   : > { %v480_v20 = vadd.f32 %v479_v19, %v438_v18  ;;  %v557_v59 = vpop.permute.xlu1 %556 }
  0xa4   : > { %v482_v35 = vmax.f32 %v471_v32, 0.0 }
  0xa5   : > { %v485_v22 = vmax.f32 %v480_v20, 0.0 }
  0xa7   : > { %519 = vmatpush.msrb.mxu1 %v485_v22 }
  0xa9   : > { %v473_v24 = vpop.f32.mrf.mxu0 }
  0xaa   : > { %v474_v29 = vadd.f32 %v473_v24, %v428_v23  ;;  %v547_v2 = vpop.permute.xlu0 %546 }
  0xab   : > { %v617_v9 = vpop.permute.xlu1 %616 }
  0xac   : > { %v483_v34 = vmax.f32 %v474_v29, 0.0 }
  0xb1   : > { %v476_v27 = vpop.f32.mrf.mxu0 }
  0xb2   : > { %v477_v30 = vadd.f32 %v476_v27, %v433_v26 }
  0xb4   : > { %v484_v33 = vmax.f32 %v477_v30, 0.0 }
  0xb6   : > { %520 = vmatpush.msrb.mxu1 %v484_v33 }
  0xb8   : > { %521 = vmatpush.msrb.mxu1 %v483_v34 }
  0xba   : > { %522 = vmatpush.msrb.mxu1 %v482_v35 }
  0xbb   : > { %831 = vmatmul.msk.f32.vlgmr.msrb.gmra.mxu1 %vm500_vm1, %v486_v36 }
  0xc3   : > { %832 = vmatmul.msk.f32.gmra.mxu1 %vm500_vm1, %v487_v38 }
 0x138   : > { %v524_v41 = vpop.f32.mrf.mxu1 }
 0x139   : > { %v525_v42 = vadd.f32 %v524_v41, %v493_v40 }
 0x13b   : > { %693 = vst [vmem:[%s1063_s29 + $0x10] sm:$0xff] %v525_v42 }
 0x140   : > { %v527_v43 = vpop.f32.mrf.mxu1 }
 0x141   : > { %v528_v44 = vadd.f32 %v527_v43, %v498_v39 }
 0x142   : > { %v742_v43 = vld [vmem:[%s1063_s29 + $0x10] sm:$0xff] (%p990_p5) }
 0x143   : > { %v530_v45 = vmul.f32 0.5, %v528_v44  ;;  %694 = vst [vmem:[%s1063_s29 + $0x18] sm:$0xff] %v528_v44 }
 0x144   : > { %743 = vst [vmem:[%s703_s15 + $0x20] sm:$0xff] (%p990_p5), %v742_v43 }
 0x145   : > { %v531_v46 = vmul.f32 1.442695, %v530_v45 }
 0x147   : > { %875 = vpow2.f32 %v531_v46 }
 0x14a   : > { %v744_v44 = vld [vmem:[%s1063_s29 + $0x18] sm:$0xff] (%p990_p5) }
 0x14b   : > { %745 = vst [vmem:[%s703_s15 + $0x30] sm:$0xff] (%p990_p5), %v744_v44 }
 0x14d   : > { %v876_v48 = vpop.eup %875 }
 0x14e   : > { %v534_v49 = vmul.f32 %v876_v48, %v533_v47 }
 0x150   : > { %v535_v50 = vadd.f32 %v534_v49, %v525_v42 }
 0x152   : > { %592 = vmatpush.msra.mxu2 %v535_v50 }
 0x153   : > { %833 = vmatmul.msk.f32.vlgmr.msra.gmra.mxu2 %vm564_vm2, %v536_v51 }
 0x15b   : > { %834 = vmatmul.msk.f32.gmra.mxu2 %vm564_vm2, %v537_v52 }
 0x163   : > { %835 = vmatmul.msk.f32.gmra.mxu2 %vm564_vm2, %v538_v53 }
 0x16b   : > { %836 = vmatmul.msk.f32.gmra.mxu2 %vm564_vm2, %v539_v54 }
 0x1d6   : > { %v594_v55 = vpop.f32.mrf.mxu2 }
 0x1d7   : > { %v595_v3 = vadd.f32 %v594_v55, %v547_v2 }
 0x1d9   : > { %v606_v6 = vmax.f32 %v595_v3, 0.0 }
 0x1de   : > { %v597_v56 = vpop.f32.mrf.mxu2 }
 0x1df   : > { %v598_v0 = vadd.f32 %v597_v56, %v552_v63 }
 0x1e1   : > { %v607_v5 = vmax.f32 %v598_v0, 0.0 }
 0x1e6   : > { %v600_v57 = vpop.f32.mrf.mxu2 }
 0x1e7   : > { %v601_v61 = vadd.f32 %v600_v57, %v557_v59 }
 0x1e9   : > { %v608_v4 = vmax.f32 %v601_v61, 0.0 }
 0x1ee   : > { %v603_v60 = vpop.f32.mrf.mxu2 }
 0x1ef   : > { %v604_v62 = vadd.f32 %v603_v60, %v562_v58 }
 0x1f1   : > { %v609_v1 = vmax.f32 %v604_v62, 0.0 }
 0x1f3   : > { %642 = vmatpush.msra.mxu3 %v609_v1 }
 0x1f5   : > { %643 = vmatpush.msra.mxu3 %v608_v4 }
 0x1f7   : > { %644 = vmatpush.msra.mxu3 %v607_v5 }
 0x1f9   : > { %645 = vmatpush.msra.mxu3 %v606_v6 }
 0x1fa   : > { %837 = vmatmul.msk.f32.vlgmr.msra.gmra.mxu3 %vm500_vm1, %v610_v7 }
 0x202   : > { %838 = vmatmul.msk.f32.gmra.mxu3 %vm500_vm1, %v611_v8 }
 0x27d   : > { %v647_v10 = vpop.f32.mrf.mxu3 }
 0x27e   : > { %v648_v11 = vadd.f32 %v647_v10, %v617_v9 }
 0x280   : > { %v839_v12 = vmul.f32 -1.442695, %v648_v11 }
 0x282   : > { %877 = vpow2.f32 %v839_v12 }
 0x285   : > { %v650_v14 = vpop.f32.mrf.mxu3 }
 0x286   : > { %v651_v15 = vadd.f32 %v650_v14, %v622_v13 }
 0x288   : > { %v878_v16 = vpop.eup %877  ;;  %v840_v17 = vmul.f32 -1.442695, %v651_v15 }
 0x289   : > { %v659_v18 = vadd.f32 1.0, %v878_v16 }
 0x28a   : > { %879 = vpow2.f32 %v840_v17 }
 0x28b   : > { %881 = vrcp.f32 %v659_v18  ;;  %v672_v24 = vand.u32 2147483648, %v659_v18  ;;  %v670_v26 = vand.u32 2147483647, %v659_v18  ;;  %vm666_vm4 = vweird.f32 %v659_v18 }
 0x28d   : > { %v673_v29 = vor.u32 1.1754944e-38, %v672_v24  ;;  %vm671_vm6 = vcmp.eq.f32.partialorder %v670_v26, 8.507059e+37 }
 0x290   : > { %v880_v19 = vpop.eup %879 }
 0x291   : > { %v882_v20 = vpop.eup %881  ;;  %v660_v21 = vadd.f32 1.0, %v880_v19 }
 0x292   : > { %v662_v22 = vmul.f32 %v882_v20, %v659_v18  ;;  %vm667_vm3 = vweird.f32 %v882_v20 }
 0x293   : > { %883 = vrcp.f32 %v660_v21  ;;  %vm668_vm5 = vmor %vm666_vm4, %vm667_vm3  ;;  %v687_v34 = vand.u32 2147483648, %v660_v21  ;;  %v685_v36 = vand.u32 2147483647, %v660_v21  ;;  %vm681_vm8 = vweird.f32 %v660_v21 }
 0x294   : > { %v663_v23 = vsub.f32 1.0, %v662_v22 }
 0x295   : > { %v688_v38 = vor.u32 1.1754944e-38, %v687_v34  ;;  %vm686_vm10 = vcmp.eq.f32.partialorder %v685_v36, 8.507059e+37 }
 0x296   : > { %v664_v25 = vmul.f32 %v882_v20, %v663_v23 }
 0x298   : > { %v665_v27 = vadd.f32 %v882_v20, %v664_v25 }
 0x299   : > { %v884_v28 = vpop.eup %883 }
 0x29a   : > { %v669_v30 = vsel %vm668_vm5, %v882_v20, %v665_v27  ;;  %v677_v31 = vmul.f32 %v884_v28, %v660_v21  ;;  %vm682_vm7 = vweird.f32 %v884_v28 }
 0x29b   : > { %v674_v32 = vsel %vm671_vm6, %v673_v29, %v669_v30  ;;  %vm683_vm9 = vmor %vm681_vm8, %vm682_vm7 }
 0x29c   : > { %691 = vst [vmem:[%s1063_s29] sm:$0xff] %v674_v32  ;;  %v678_v33 = vsub.f32 1.0, %v677_v31 }
 0x29e   : > { %v679_v35 = vmul.f32 %v884_v28, %v678_v33 }
 0x2a0   : > { %v680_v37 = vadd.f32 %v884_v28, %v679_v35  ;;  %701 = sbr.rel (!%p990_p5) target bundleno = 685 (0x2ad), region = 102 }
 0x2a2   : > { %v684_v39 = vsel %vm683_vm9, %v884_v28, %v680_v37 }
 0x2a3   : > { %v689_v40 = vsel %vm686_vm10, %v688_v38, %v684_v39  ;;  %v738_v41 = vld [vmem:[%s1063_s29] sm:$0xff] (%p990_p5) }
 0x2a4   : > { %692 = vst [vmem:[%s1063_s29 + $0x8] sm:$0xff] %v689_v40 }
 0x2a5   : > { %739 = vst [vmem:[%s703_s15] sm:$0xff] %v738_v41 }
 0x2ab   : > { %v740_v42 = vld [vmem:[%s1063_s29 + $0x8] sm:$0xff] }
 0x2ac   : > { %741 = vst [vmem:[%s703_s15 + $0x10] sm:$0xff] %v740_v42 }
 0x2ad PF: > { %p17_p11 = scmp.ge.s32.totalorder %s980_s17, 4   ;;  %s1126_s13 = smov %s903_s14 }
 0x2ae   : > { %s1127_s14 = smov %s988_s20  ;;  %s1128_s15 = smov %s980_s17 }
 0x2af   :  { %19 = sbr.rel (!%p17_p11) target bundleno = 2 (0x2), region = 174 }

</bundles_post_ra>
